<compile_context>
chip_gen: v7x
topology: tpu7x:2x2x1
jax: 0.10.0
libtpu: 0.0.40
codegen_flags: <defaults>
</compile_context>

<pallas_src>
import functools

import jax
import jax.numpy as jnp
import numpy as np
from jax import lax
from jax.experimental import pallas as pl
from jax.experimental.pallas import tpu as pltpu

BN_EPS = 1e-5


# ----------------------------------------------------------------------------- kernel
def _stem_kernel(x_ref, w_ref, mask_ref, bias_ref, o_ref, *, W):
    # x_ref    : (1, CinP, HWp)   one sample; channels zero-padded to CinP (=8),
    #                             spatial flattened (and zero-padded) on the lane dim
    # w_ref    : (9, Cout, CinP)  BN-scale-folded weight, tap t = (dy+1)*3 + (dx+1)
    # mask_ref : (9, 1, HWp)      per-tap validity mask (0/1, f32)
    # bias_ref : (Cout, 1)        folded BatchNorm bias
    # o_ref    : (1, Cout, HWp)   lane-dense output
    x = x_ref[0]                                    # (CinP, HWp)
    hwp = x.shape[-1]
    cout = o_ref.shape[1]

    acc = jnp.zeros((cout, hwp), jnp.float32)
    t = 0
    for dy in (-1, 0, 1):
        for dx in (-1, 0, 1):
            shift = dy * W + dx                     # static Python int
            # rolled[ci, p] = x[ci, (p + shift) mod HWp]; out-of-image taps get
            # zeroed by the mask, so the wrap-around values never contribute.
            rolled = x if shift == 0 else pltpu.roll(x, (-shift) % hwp, axis=1)
            tap = rolled * mask_ref[t]              # full-width, 8-sublane aligned
            acc = acc + jnp.dot(w_ref[t], tap, preferred_element_type=jnp.float32)
            t += 1

    o_ref[0] = (acc + bias_ref[...]).astype(o_ref.dtype)


# ----------------------------------------------------------------------------- wrapper
def stem_forward(x_nchw, w_oihw, scale, bias):
    """3x3 conv (pad=1, stride=1, no bias) + folded eval-mode BN.  NCHW in / NCHW out."""
    n, cin, height, width = x_nchw.shape
    cout = w_oihw.shape[0]
    hw = height * width
    hwp = ((hw + 127) // 128) * 128                 # lane-dense: pad spatial to 128x
    cinp = ((max(cin, 8) + 7) // 8) * 8             # sublane-aligned channel count

    # ---- layout plumbing only (cheap XLA reshapes / pads) ----
    x2 = x_nchw.reshape(n, cin, hw)
    x2 = jnp.pad(x2, ((0, 0), (0, cinp - cin), (0, hwp - hw)))           # (N, CinP, HWp)

    wf = w_oihw * scale[:, None, None, None]                             # fold BN scale
    w9 = jnp.transpose(wf, (2, 3, 0, 1)).reshape(9, cout, cin)           # (ky,kx,O,I)->(9,O,I)
    w9 = jnp.pad(w9, ((0, 0), (0, 0), (0, cinp - cin)))                  # (9, Cout, CinP)

    # ---- per-tap validity masks, built once at trace time (numpy, static) ----
    p = np.arange(hwp)
    hh, ww = p // width, p % width
    masks = np.zeros((9, 1, hwp), np.float32)
    t = 0
    for dy in (-1, 0, 1):
        for dx in (-1, 0, 1):
            valid = ((p < hw) & (hh + dy >= 0) & (hh + dy < height)
                     & (ww + dx >= 0) & (ww + dx < width))
            masks[t, 0] = valid
            t += 1
    masks = jnp.asarray(masks)

    out = pl.pallas_call(
        functools.partial(_stem_kernel, W=width),
        out_shape=jax.ShapeDtypeStruct((n, cout, hwp), x_nchw.dtype),
        grid=(n,),
        in_specs=[
            pl.BlockSpec((1, cinp, hwp), lambda b: (b, 0, 0)),     # x: one sample per step
            pl.BlockSpec((9, cout, cinp), lambda b: (0, 0, 0)),    # weights (resident)
            pl.BlockSpec((9, 1, hwp), lambda b: (0, 0, 0)),        # masks   (resident)
            pl.BlockSpec((cout, 1), lambda b: (0, 0)),             # bias    (resident)
        ],
        out_specs=pl.BlockSpec((1, cout, hwp), lambda b: (b, 0, 0)),
        compiler_params=pltpu.CompilerParams(
            dimension_semantics=("parallel",),                     # both TCs on v7x
            vmem_limit_bytes=32 * 1024 * 1024,
        ),
    )(x2, w9, masks, bias.reshape(cout, 1))

    return out[:, :, :hw].reshape(n, cout, height, width)


# ----------------------------------------------------------------------------- module
class StemPallas:
    """Forward-only port of `stem`: Conv2d(3, C, 3, pad=1, bias=False) [+ BatchNorm2d]."""

    def __init__(self, out_channels, key, use_bn=True, in_channels=3):
        k_w, k_g, k_b = jax.random.split(key, 3)
        fan_in = in_channels * 9
        self.weight = jax.random.normal(
            k_w, (out_channels, in_channels, 3, 3), jnp.float32) / np.sqrt(fan_in)
        self.use_bn = use_bn
        self.out_channels = out_channels
        if use_bn:
            self.gamma = 1.0 + 0.1 * jax.random.normal(k_g, (out_channels,), jnp.float32)
            self.beta = 0.1 * jax.random.normal(k_b, (out_channels,), jnp.float32)
        # TODO(synk): training-mode BatchNorm (batch statistics + running-stat updates)
        # is not translated; eval-mode semantics of a fresh BatchNorm2d
        # (running_mean=0, running_var=1) are reproduced and folded into scale/bias.

    def _fold_bn(self):
        c = self.out_channels
        if not self.use_bn:
            return jnp.ones((c,), jnp.float32), jnp.zeros((c,), jnp.float32)
        scale = self.gamma / jnp.sqrt(1.0 + BN_EPS)
        return scale, self.beta

    def __call__(self, x_nchw):
        scale, bias = self._fold_bn()
        return stem_forward(x_nchw, self.weight, scale, bias)


# ----------------------------------------------------------------------------- pure-JAX reference
def ref_forward(module, x_nchw):
    scale, bias = module._fold_bn()
    y = lax.conv_general_dilated(
        x_nchw, module.weight, window_strides=(1, 1), padding='SAME',
        dimension_numbers=('NCHW', 'OIHW', 'NCHW'))
    return y * scale[None, :, None, None] + bias[None, :, None, None]


# ----------------------------------------------------------------------------- main
if __name__ == "__main__":
    key = jax.random.PRNGKey(0)
    k_x, k_p = jax.random.split(key)

    N, C_IN, H, W = 2, 3, 16, 16       # stem input is RGB (3 channels), NCHW like PyTorch
    C_OUT = 16
    x = jax.random.normal(k_x, (N, C_IN, H, W), jnp.float32)

    model = StemPallas(C_OUT, key=k_p, use_bn=True)
    out = jax.block_until_ready(model(x))

    ref = jax.block_until_ready(ref_forward(model, x))
    assert out.shape == (N, C_OUT, H, W)
    np.testing.assert_allclose(np.asarray(out), np.asarray(ref), atol=1e-4, rtol=1e-4)

    print("KERNEL_OK")
</pallas_src>

<mosaic_0001>
module attributes {stable_mosaic.version = 11 : i64} {
  func.func @_stem_kernel(%arg0: i32, %arg1: memref<1x8x256xf32, #tpu.memory_space<vmem>>, %arg2: memref<9x16x8xf32, #tpu.memory_space<vmem>>, %arg3: memref<9x1x256xf32, #tpu.memory_space<vmem>>, %arg4: memref<16x1xf32, #tpu.memory_space<vmem>>, %arg5: memref<1x16x256xf32, #tpu.memory_space<vmem>>) attributes {dimension_semantics = [#tpu.dimension_semantics<parallel>], iteration_bounds = array<i64: 2>, scalar_prefetch = 0 : i64, scratch_operands = 0 : i64, tpu.core_type = #tpu.core_type<tc>, window_params = [{transform_indices = @transform_0, window_bounds = array<i64: 1, 8, 256>}, {pipeline_mode = #tpu.pipeline_mode<synchronous>, transform_indices = @transform_1, window_bounds = array<i64: 9, 16, 8>}, {pipeline_mode = #tpu.pipeline_mode<synchronous>, transform_indices = @transform_2, window_bounds = array<i64: 9, 1, 256>}, {pipeline_mode = #tpu.pipeline_mode<synchronous>, transform_indices = @transform_3, window_bounds = array<i64: 16, 1>}, {transform_indices = @transform_4, window_bounds = array<i64: 1, 16, 256>}]} {
    %c0 = arith.constant 0 : index
    %c0_0 = arith.constant 0 : index
    %c0_1 = arith.constant 0 : index
    %0 = vector.load %arg1[%c0, %c0_0, %c0_1] : memref<1x8x256xf32, #tpu.memory_space<vmem>>, vector<1x8x256xf32>
    %1 = vector.shape_cast %0 : vector<1x8x256xf32> to vector<8x256xf32>
    %cst = arith.constant 0.000000e+00 : f32
    %2 = vector.broadcast %cst : f32 to vector<16x256xf32>
    %c17_i32 = arith.constant 17 : i32
    %3 = tpu.dynamic_rotate %1 by %c17_i32 dim 1 : vector<8x256xf32>, i32 -> vector<8x256xf32>
    %c0_2 = arith.constant 0 : index
    %c0_3 = arith.constant 0 : index
    %c0_4 = arith.constant 0 : index
    %4 = vector.load %arg3[%c0_2, %c0_3, %c0_4] : memref<9x1x256xf32, #tpu.memory_space<vmem>>, vector<1x1x256xf32>
    %5 = vector.shape_cast %4 : vector<1x1x256xf32> to vector<1x256xf32>
    %6 = vector.broadcast %5 : vector<1x256xf32> to vector<8x256xf32>
    %7 = arith.mulf %3, %6 : vector<8x256xf32>
    %c0_5 = arith.constant 0 : index
    %c0_6 = arith.constant 0 : index
    %c0_7 = arith.constant 0 : index
    %8 = vector.load %arg2[%c0_5, %c0_6, %c0_7] : memref<9x16x8xf32, #tpu.memory_space<vmem>>, vector<1x16x8xf32>
    %9 = vector.shape_cast %8 : vector<1x16x8xf32> to vector<16x8xf32>
    %cst_8 = arith.constant dense<0.000000e+00> : vector<16x256xf32>
    %10 = tpu.matmul %9, %7, %cst_8 {dimension_numbers = #tpu.dot_dimension_numbers<[1], [0], [0], [1], [0, 0, 1, 1], [], []>} : vector<16x8xf32>, vector<8x256xf32>, vector<16x256xf32> -> vector<16x256xf32>
    %11 = arith.addf %2, %10 : vector<16x256xf32>
    %c16_i32 = arith.constant 16 : i32
    %12 = tpu.dynamic_rotate %1 by %c16_i32 dim 1 : vector<8x256xf32>, i32 -> vector<8x256xf32>
    %c1 = arith.constant 1 : index
    %c0_9 = arith.constant 0 : index
    %c0_10 = arith.constant 0 : index
    %13 = vector.load %arg3[%c1, %c0_9, %c0_10] : memref<9x1x256xf32, #tpu.memory_space<vmem>>, vector<1x1x256xf32>
    %14 = vector.shape_cast %13 : vector<1x1x256xf32> to vector<1x256xf32>
    %15 = vector.broadcast %14 : vector<1x256xf32> to vector<8x256xf32>
    %16 = arith.mulf %12, %15 : vector<8x256xf32>
    %c1_11 = arith.constant 1 : index
    %c0_12 = arith.constant 0 : index
    %c0_13 = arith.constant 0 : index
    %17 = vector.load %arg2[%c1_11, %c0_12, %c0_13] : memref<9x16x8xf32, #tpu.memory_space<vmem>>, vector<1x16x8xf32>
    %18 = vector.shape_cast %17 : vector<1x16x8xf32> to vector<16x8xf32>
    %cst_14 = arith.constant dense<0.000000e+00> : vector<16x256xf32>
    %19 = tpu.matmul %18, %16, %cst_14 {dimension_numbers = #tpu.dot_dimension_numbers<[1], [0], [0], [1], [0, 0, 1, 1], [], []>} : vector<16x8xf32>, vector<8x256xf32>, vector<16x256xf32> -> vector<16x256xf32>
    %20 = arith.addf %11, %19 : vector<16x256xf32>
    %c15_i32 = arith.constant 15 : i32
    %21 = tpu.dynamic_rotate %1 by %c15_i32 dim 1 : vector<8x256xf32>, i32 -> vector<8x256xf32>
    %c2 = arith.constant 2 : index
    %c0_15 = arith.constant 0 : index
    %c0_16 = arith.constant 0 : index
    %22 = vector.load %arg3[%c2, %c0_15, %c0_16] : memref<9x1x256xf32, #tpu.memory_space<vmem>>, vector<1x1x256xf32>
    %23 = vector.shape_cast %22 : vector<1x1x256xf32> to vector<1x256xf32>
    %24 = vector.broadcast %23 : vector<1x256xf32> to vector<8x256xf32>
    %25 = arith.mulf %21, %24 : vector<8x256xf32>
    %c2_17 = arith.constant 2 : index
    %c0_18 = arith.constant 0 : index
    %c0_19 = arith.constant 0 : index
    %26 = vector.load %arg2[%c2_17, %c0_18, %c0_19] : memref<9x16x8xf32, #tpu.memory_space<vmem>>, vector<1x16x8xf32>
    %27 = vector.shape_cast %26 : vector<1x16x8xf32> to vector<16x8xf32>
    %cst_20 = arith.constant dense<0.000000e+00> : vector<16x256xf32>
    %28 = tpu.matmul %27, %25, %cst_20 {dimension_numbers = #tpu.dot_dimension_numbers<[1], [0], [0], [1], [0, 0, 1, 1], [], []>} : vector<16x8xf32>, vector<8x256xf32>, vector<16x256xf32> -> vector<16x256xf32>
    %29 = arith.addf %20, %28 : vector<16x256xf32>
    %c1_i32 = arith.constant 1 : i32
    %30 = tpu.dynamic_rotate %1 by %c1_i32 dim 1 : vector<8x256xf32>, i32 -> vector<8x256xf32>
    %c3 = arith.constant 3 : index
    %c0_21 = arith.constant 0 : index
    %c0_22 = arith.constant 0 : index
    %31 = vector.load %arg3[%c3, %c0_21, %c0_22] : memref<9x1x256xf32, #tpu.memory_space<vmem>>, vector<1x1x256xf32>
    %32 = vector.shape_cast %31 : vector<1x1x256xf32> to vector<1x256xf32>
    %33 = vector.broadcast %32 : vector<1x256xf32> to vector<8x256xf32>
    %34 = arith.mulf %30, %33 : vector<8x256xf32>
    %c3_23 = arith.constant 3 : index
    %c0_24 = arith.constant 0 : index
    %c0_25 = arith.constant 0 : index
    %35 = vector.load %arg2[%c3_23, %c0_24, %c0_25] : memref<9x16x8xf32, #tpu.memory_space<vmem>>, vector<1x16x8xf32>
    %36 = vector.shape_cast %35 : vector<1x16x8xf32> to vector<16x8xf32>
    %cst_26 = arith.constant dense<0.000000e+00> : vector<16x256xf32>
    %37 = tpu.matmul %36, %34, %cst_26 {dimension_numbers = #tpu.dot_dimension_numbers<[1], [0], [0], [1], [0, 0, 1, 1], [], []>} : vector<16x8xf32>, vector<8x256xf32>, vector<16x256xf32> -> vector<16x256xf32>
    %38 = arith.addf %29, %37 : vector<16x256xf32>
    %c4 = arith.constant 4 : index
    %c0_27 = arith.constant 0 : index
    %c0_28 = arith.constant 0 : index
    %39 = vector.load %arg3[%c4, %c0_27, %c0_28] : memref<9x1x256xf32, #tpu.memory_space<vmem>>, vector<1x1x256xf32>
    %40 = vector.shape_cast %39 : vector<1x1x256xf32> to vector<1x256xf32>
    %41 = vector.broadcast %40 : vector<1x256xf32> to vector<8x256xf32>
    %42 = arith.mulf %1, %41 : vector<8x256xf32>
    %c4_29 = arith.constant 4 : index
    %c0_30 = arith.constant 0 : index
    %c0_31 = arith.constant 0 : index
    %43 = vector.load %arg2[%c4_29, %c0_30, %c0_31] : memref<9x16x8xf32, #tpu.memory_space<vmem>>, vector<1x16x8xf32>
    %44 = vector.shape_cast %43 : vector<1x16x8xf32> to vector<16x8xf32>
    %cst_32 = arith.constant dense<0.000000e+00> : vector<16x256xf32>
    %45 = tpu.matmul %44, %42, %cst_32 {dimension_numbers = #tpu.dot_dimension_numbers<[1], [0], [0], [1], [0, 0, 1, 1], [], []>} : vector<16x8xf32>, vector<8x256xf32>, vector<16x256xf32> -> vector<16x256xf32>
    %46 = arith.addf %38, %45 : vector<16x256xf32>
    %c255_i32 = arith.constant 255 : i32
    %47 = tpu.dynamic_rotate %1 by %c255_i32 dim 1 : vector<8x256xf32>, i32 -> vector<8x256xf32>
    %c5 = arith.constant 5 : index
    %c0_33 = arith.constant 0 : index
    %c0_34 = arith.constant 0 : index
    %48 = vector.load %arg3[%c5, %c0_33, %c0_34] : memref<9x1x256xf32, #tpu.memory_space<vmem>>, vector<1x1x256xf32>
    %49 = vector.shape_cast %48 : vector<1x1x256xf32> to vector<1x256xf32>
    %50 = vector.broadcast %49 : vector<1x256xf32> to vector<8x256xf32>
    %51 = arith.mulf %47, %50 : vector<8x256xf32>
    %c5_35 = arith.constant 5 : index
    %c0_36 = arith.constant 0 : index
    %c0_37 = arith.constant 0 : index
    %52 = vector.load %arg2[%c5_35, %c0_36, %c0_37] : memref<9x16x8xf32, #tpu.memory_space<vmem>>, vector<1x16x8xf32>
    %53 = vector.shape_cast %52 : vector<1x16x8xf32> to vector<16x8xf32>
    %cst_38 = arith.constant dense<0.000000e+00> : vector<16x256xf32>
    %54 = tpu.matmul %53, %51, %cst_38 {dimension_numbers = #tpu.dot_dimension_numbers<[1], [0], [0], [1], [0, 0, 1, 1], [], []>} : vector<16x8xf32>, vector<8x256xf32>, vector<16x256xf32> -> vector<16x256xf32>
    %55 = arith.addf %46, %54 : vector<16x256xf32>
    %c241_i32 = arith.constant 241 : i32
    %56 = tpu.dynamic_rotate %1 by %c241_i32 dim 1 : vector<8x256xf32>, i32 -> vector<8x256xf32>
    %c6 = arith.constant 6 : index
    %c0_39 = arith.constant 0 : index
    %c0_40 = arith.constant 0 : index
    %57 = vector.load %arg3[%c6, %c0_39, %c0_40] : memref<9x1x256xf32, #tpu.memory_space<vmem>>, vector<1x1x256xf32>
    %58 = vector.shape_cast %57 : vector<1x1x256xf32> to vector<1x256xf32>
    %59 = vector.broadcast %58 : vector<1x256xf32> to vector<8x256xf32>
    %60 = arith.mulf %56, %59 : vector<8x256xf32>
    %c6_41 = arith.constant 6 : index
    %c0_42 = arith.constant 0 : index
    %c0_43 = arith.constant 0 : index
    %61 = vector.load %arg2[%c6_41, %c0_42, %c0_43] : memref<9x16x8xf32, #tpu.memory_space<vmem>>, vector<1x16x8xf32>
    %62 = vector.shape_cast %61 : vector<1x16x8xf32> to vector<16x8xf32>
    %cst_44 = arith.constant dense<0.000000e+00> : vector<16x256xf32>
    %63 = tpu.matmul %62, %60, %cst_44 {dimension_numbers = #tpu.dot_dimension_numbers<[1], [0], [0], [1], [0, 0, 1, 1], [], []>} : vector<16x8xf32>, vector<8x256xf32>, vector<16x256xf32> -> vector<16x256xf32>
    %64 = arith.addf %55, %63 : vector<16x256xf32>
    %c240_i32 = arith.constant 240 : i32
    %65 = tpu.dynamic_rotate %1 by %c240_i32 dim 1 : vector<8x256xf32>, i32 -> vector<8x256xf32>
    %c7 = arith.constant 7 : index
    %c0_45 = arith.constant 0 : index
    %c0_46 = arith.constant 0 : index
    %66 = vector.load %arg3[%c7, %c0_45, %c0_46] : memref<9x1x256xf32, #tpu.memory_space<vmem>>, vector<1x1x256xf32>
    %67 = vector.shape_cast %66 : vector<1x1x256xf32> to vector<1x256xf32>
    %68 = vector.broadcast %67 : vector<1x256xf32> to vector<8x256xf32>
    %69 = arith.mulf %65, %68 : vector<8x256xf32>
    %c7_47 = arith.constant 7 : index
    %c0_48 = arith.constant 0 : index
    %c0_49 = arith.constant 0 : index
    %70 = vector.load %arg2[%c7_47, %c0_48, %c0_49] : memref<9x16x8xf32, #tpu.memory_space<vmem>>, vector<1x16x8xf32>
    %71 = vector.shape_cast %70 : vector<1x16x8xf32> to vector<16x8xf32>
    %cst_50 = arith.constant dense<0.000000e+00> : vector<16x256xf32>
    %72 = tpu.matmul %71, %69, %cst_50 {dimension_numbers = #tpu.dot_dimension_numbers<[1], [0], [0], [1], [0, 0, 1, 1], [], []>} : vector<16x8xf32>, vector<8x256xf32>, vector<16x256xf32> -> vector<16x256xf32>
    %73 = arith.addf %64, %72 : vector<16x256xf32>
    %c239_i32 = arith.constant 239 : i32
    %74 = tpu.dynamic_rotate %1 by %c239_i32 dim 1 : vector<8x256xf32>, i32 -> vector<8x256xf32>
    %c8 = arith.constant 8 : index
    %c0_51 = arith.constant 0 : index
    %c0_52 = arith.constant 0 : index
    %75 = vector.load %arg3[%c8, %c0_51, %c0_52] : memref<9x1x256xf32, #tpu.memory_space<vmem>>, vector<1x1x256xf32>
    %76 = vector.shape_cast %75 : vector<1x1x256xf32> to vector<1x256xf32>
    %77 = vector.broadcast %76 : vector<1x256xf32> to vector<8x256xf32>
    %78 = arith.mulf %74, %77 : vector<8x256xf32>
    %c8_53 = arith.constant 8 : index
    %c0_54 = arith.constant 0 : index
    %c0_55 = arith.constant 0 : index
    %79 = vector.load %arg2[%c8_53, %c0_54, %c0_55] : memref<9x16x8xf32, #tpu.memory_space<vmem>>, vector<1x16x8xf32>
    %80 = vector.shape_cast %79 : vector<1x16x8xf32> to vector<16x8xf32>
    %cst_56 = arith.constant dense<0.000000e+00> : vector<16x256xf32>
    %81 = tpu.matmul %80, %78, %cst_56 {dimension_numbers = #tpu.dot_dimension_numbers<[1], [0], [0], [1], [0, 0, 1, 1], [], []>} : vector<16x8xf32>, vector<8x256xf32>, vector<16x256xf32> -> vector<16x256xf32>
    %82 = arith.addf %73, %81 : vector<16x256xf32>
    %c0_57 = arith.constant 0 : index
    %c0_58 = arith.constant 0 : index
    %83 = vector.load %arg4[%c0_57, %c0_58] : memref<16x1xf32, #tpu.memory_space<vmem>>, vector<16x1xf32>
    %84 = vector.broadcast %83 : vector<16x1xf32> to vector<16x256xf32>
    %85 = arith.addf %82, %84 : vector<16x256xf32>
    %c0_59 = arith.constant 0 : index
    %c0_60 = arith.constant 0 : index
    %c0_61 = arith.constant 0 : index
    %86 = vector.load %arg5[%c0_59, %c0_60, %c0_61] : memref<1x16x256xf32, #tpu.memory_space<vmem>>, vector<1x16x256xf32>
    %87 = vector.shape_cast %86 : vector<1x16x256xf32> to vector<16x256xf32>
    %88 = vector.shape_cast %85 : vector<16x256xf32> to vector<1x16x256xf32>
    tpu.vector_store %arg5[%c0_59, %c0_60, %c0_61], %88 {strides = array<i32>} : memref<1x16x256xf32, #tpu.memory_space<vmem>>, vector<1x16x256xf32>,
    return
  }
  func.func @transform_0(%arg0: i32) -> (i32, i32, i32) {
    %c0_i32 = arith.constant 0 : i32
    %c0_i32_0 = arith.constant 0 : i32
    %c0_i32_1 = arith.constant 0 : i32
    return %arg0, %c0_i32, %c0_i32_0 : i32, i32, i32
  }
  func.func @transform_1(%arg0: i32) -> (i32, i32, i32) {
    %c0_i32 = arith.constant 0 : i32
    %c0_i32_0 = arith.constant 0 : i32
    %c0_i32_1 = arith.constant 0 : i32
    %c0_i32_2 = arith.constant 0 : i32
    return %c0_i32, %c0_i32_0, %c0_i32_1 : i32, i32, i32
  }
  func.func @transform_2(%arg0: i32) -> (i32, i32, i32) {
    %c0_i32 = arith.constant 0 : i32
    %c0_i32_0 = arith.constant 0 : i32
    %c0_i32_1 = arith.constant 0 : i32
    %c0_i32_2 = arith.constant 0 : i32
    return %c0_i32, %c0_i32_0, %c0_i32_1 : i32, i32, i32
  }
  func.func @transform_3(%arg0: i32) -> (i32, i32) {
    %c0_i32 = arith.constant 0 : i32
    %c0_i32_0 = arith.constant 0 : i32
    %c0_i32_1 = arith.constant 0 : i32
    return %c0_i32, %c0_i32_0 : i32, i32
  }
  func.func @transform_4(%arg0: i32) -> (i32, i32, i32) {
    %c0_i32 = arith.constant 0 : i32
    %c0_i32_0 = arith.constant 0 : i32
    %c0_i32_1 = arith.constant 0 : i32
    return %arg0, %c0_i32, %c0_i32_0 : i32, i32, i32
  }
}

</mosaic_0001>

<bundles_post_ra>
// kernel: tpu_custom_call.1
= control target key start
LH: loop header
LB: loop body
LE: loop exit
PB: predicated region body
PF: predicated region fallthrough
CT: control target
= control target key end

     0   :  { %9 = vsyncpa [#allocation3], 0  ;;  %s1804_s0 = inlined_call_operand.vmem [shape: f32[2,8,256], index: 0, kind: input, shape index: {}]   ;;  %s1805_s1 = inlined_call_operand.vmem [shape: f32[9,16,8], index: 1, kind: input, shape index: {}]   ;;  %s1806_s2 = inlined_call_operand.vmem [shape: f32[9,1,256], index: 2, kind: input, shape index: {}]   ;;  %s1807_s3 = inlined_call_operand.vmem [shape: f32[16,1], index: 3, kind: input, shape index: {}]   ;;  %s1808_s4 = inlined_call_operand.hbm [shape: f32[2,16,256], index: 4, kind: output, shape index: {}]  }
   0x1   :  { %11 = vsyncpa [#allocation3 + $0x1], 0  ;;  %s1531_s15 = smov 0   ;;  %s1533_s16 = smov 0  }
   0x2   :  { %s1535_s17 = smov 0   ;;  %s1537_s18 = smov 0  }
   0x3 LB: > { %s1552_s19 = sadd.s32 4294967295, %s1492_s18   ;;  %s1288_s20 = sadd.s32 4294967294, %s1492_s18   ;;  %s1492_s18 = sphi %s1537_s18, %s1814_s18   ;;  %s1488_s17 = sphi %s1535_s17, %s1813_s17   ;;  %s1484_s16 = sphi %s1533_s16, %s1812_s16   ;;  %s1480_s15 = sphi %s1531_s15, %s1811_s15  }
   0x4   : > { %s1556_s21 = sadd.s32 1, %s1492_s18   ;;  %s113_s22 = sadd.s32 1, %s1488_s17 }
   0x5   : > { %s110_s23 = ssub.s32 %s1492_s18, %s1556_s21  ;;  %p123_p0 = scmp.ne.s32.totalorder %s1488_s17, %s1484_s16 }
   0x6   : > { %p111_p1 = scmp.eq.s32.totalorder %s110_s23, 0  ;;  %p124_p2 = scmp.eq.s32.totalorder %s1552_s19, 1 }
   0x7   : > { %p129_p3 = scmp.ne.s32.totalorder %s1484_s16, %s1480_s15  ;;  %p130_p4 = scmp.eq.s32.totalorder %s1288_s20, 1 }
   0x8   : > { %s1567_s24 = scalar_select %p111_p1, %s1488_s17, %s113_s22  }
   0x9   : > { %p1569_p5 = por %p124_p2, %p123_p0  ;;  %p1573_p6 = por %p130_p4, %p129_p3 }
   0xa   : > { %p1291_p7 = scmp.ge.s32.totalorder %s1492_s18, 1  ;;  %p165_p8 = scmp.lt.s32.totalorder %s1492_s18, 3 }
   0xc   : > { %p166_p9 = pnand %p1291_p7, %p165_p8 }
   0xd   : > { %p191_p10 = scmp.lt.s32.totalorder (!%p166_p9), %s1552_s19, 1  ;;  %v202_v0 = vlaneseq (!%p166_p9)  ;;  %v1494_v2 = vmov (!%p166_p9), 0.0   ;;  %v1312_v3 = vld [vmem:[%s1806_s2 + $0x8] sm:$0x3] (!%p166_p9)  ;;  %s1495_s8 = smov (!%p166_p9), 17   ;;  %vm248_vm0 = vcmask (!%p166_p9), 64512  }
   0xe   : > { %169 = sbr.rel (%p166_p9) target bundleno = 418 (0x1a2), region = 36  ;;  %727 = vmatprep.mubr.f32.mxu0 (!%p166_p9), %v1494_v2  ;;  %319 = vmatprep.mubr.f32.mxu1 (!%p166_p9), %v1494_v2  ;;  %s1496_s9 = smov (!%p166_p9), 16   ;;  %v1313_v12 = vld [vmem:[%s1805_s1 + $0x40] sm:$0xff] (!%p166_p9)  ;;  %v1193_v14 = vld [vmem:[%s1807_s3 + $0x8] sm:$0xff] (!%p166_p9)  ;;  %v1503_v15 = vmov (!%p166_p9), 0   ;;  %v1296_v39 = vld [vmem:[%s1805_s1 + $0x10] sm:$0xff] (!%p166_p9) }
   0xf   : > { %v210_v1 = vshrl.u32 (!%p166_p9), %v202_v0, 7  ;;  %s1497_s12 = smov (!%p166_p9), 127   ;;  %s1498_s13 = smov (!%p166_p9), 15   ;;  %v1192_v13 = vld [vmem:[%s1807_s3] sm:$0xff] (!%p166_p9)  ;;  %1428 = vset.pattern.permute.xlu0 (!%p166_p9), %v1503_v15  ;;  %1429 = vset.pattern.permute.xlu1 (!%p166_p9), %v1503_v15  ;;  %v1614_v16 = vand.u32 (!%p166_p9), 127, %v202_v0  ;;  %v1297_v49 = vld [vmem:[%s1805_s1 + $0x18] sm:$0xff] (!%p166_p9) }
  0x10   : > { %s1499_s14 = smov (!%p166_p9), 113   ;;  %s1500_s20 = smov (!%p166_p9), 1   ;;  %v207_v17 = vld [vmem:[%s1806_s2] sm:$0x3] (!%p166_p9)  ;;  %v1295_v18 = vld [vmem:[%s1806_s2 + $0x2] sm:$0x3] (!%p166_p9) }
  0x11   : > { %v1586_v4 = vsub.s32 (!%p166_p9), 1, %v210_v1  ;;  %v1588_v5 = vsub.s32 (!%p166_p9), 0, %v210_v1  ;;  %s1501_s22 = smov (!%p166_p9), 112   ;;  %s1502_s23 = smov (!%p166_p9), 111   ;;  %vm204_vm1 = vcmp.lt.s32.totalorder (!%p166_p9), %v1614_v16, 17  ;;  %vm227_vm2 = vcmp.lt.s32.totalorder (!%p166_p9), %v1614_v16, 16 }
  0x12   : > { %v1317_v21 = vld [vmem:[%s1806_s2 + $0xa] sm:$0x3] (!%p166_p9)  ;;  %vm748_vm3 = vcmp.lt.s32.totalorder (!%p166_p9), %v1614_v16, 127  ;;  %v1302_v38 = vld [vmem:[%s1806_s2 + $0x4] sm:$0x3] (!%p166_p9)  ;;  %vm419_vm4 = vcmp.lt.s32.totalorder (!%p166_p9), %v1614_v16, 15 }
  0x13   : > { %v649_v7 = vrot.slane (!%p166_p9), %v1312_v3, %v1586_v4  ;;  %v645_v8 = vrot.slane (!%p166_p9), %v1312_v3, %v1588_v5  ;;  %v212_v22 = vrot.slane (!%p166_p9), %v207_v17, %v1588_v5  ;;  %v216_v23 = vrot.slane (!%p166_p9), %v207_v17, %v1586_v4  ;;  %v1322_v48 = vld [vmem:[%s1806_s2 + $0xc] sm:$0x3] (!%p166_p9)  ;;  %v1318_v50 = vld [vmem:[%s1805_s1 + $0x50] sm:$0xff] (!%p166_p9)  ;;  %v1307_v59 = vld [vmem:[%s1806_s2 + $0x6] sm:$0x3] (!%p166_p9) }
  0x14   : > { %v240_v24 = vrot.slane (!%p166_p9), %v1295_v18, %v1586_v4  ;;  %v236_v25 = vrot.slane (!%p166_p9), %v1295_v18, %v1588_v5  ;;  %v757_v28 = vrot.slane (!%p166_p9), %v1317_v21, %v1588_v5  ;;  %v761_v29 = vrot.slane (!%p166_p9), %v1317_v21, %v1586_v4  ;;  %v221_v60 = vld [vmem:[%s1805_s1] sm:$0xff] (!%p166_p9)  ;;  %v1319_v61 = vld [vmem:[%s1805_s1 + $0x58] sm:$0xff] (!%p166_p9) }
  0x15   : > { %s192_s27 = scalar_select %p191_p10, %s1552_s19, 1  ;;  %v428_v44 = vrot.slane %v1302_v38, %v1588_v5  ;;  %v432_v47 = vrot.slane %v1302_v38, %v1586_v4  ;;  %v869_v55 = vrot.slane %v1322_v48, %v1588_v5  ;;  %vm860_vm5 = vcmp.lt.s32.totalorder %v1614_v16, 113 }
  0x16   : > { %v873_v58 = vrot.slane %v1322_v48, %v1586_v4  ;;  %v540_v3 = vrot.slane %v1307_v59, %v1588_v5  ;;  %vm531_vm6 = vcmp.lt.s32.totalorder %v1614_v16, 1  ;;  %vm972_vm7 = vcmp.lt.s32.totalorder %v1614_v16, 112 }
  0x17   : > { %s1342_s30 = sshll.u32 %s192_s27, 4  ;;  %vm1084_vm8 = vcmp.lt.s32.totalorder %v1614_v16, 111 }
  0x18   : > { %s195_s7 = scalar_lea.vmem %s1804_s0, %s1342_s30 }
  0x19   : > { %v196_v6 = vld [vmem:[%s195_s7] sm:$0xff]  ;;  %v197_v9 = vld [vmem:[%s195_s7 + $0x8] sm:$0xff]  ;;  %s188_s7 = sand.u32 1, %s1484_s16  }
  0x1a   : > { %198 = vrot.lane.b32.xlu1 %v196_v6, %s1495_s8  ;;  %223 = vrot.lane.b32.xlu0 %v196_v6, %s1496_s9  ;;  %v1596_v10 = vmul.f32 %v649_v7, %v197_v9  ;;  %v1598_v11 = vmul.f32 %v645_v8, %v196_v6  ;;  %v544_v8 = vrot.slane %v1307_v59, %v1586_v4 }
  0x1c   : > { %663 = vmatprep.subr.mxu0 %v1596_v10 }
  0x1d   : > { %664 = vmatpush1.msra.mxu0 %v1598_v11 }
  0x1e   : > { %200 = vrot.lane.b32.xlu1 %v197_v9, %s1495_s8  ;;  %225 = vrot.lane.b32.xlu0 %v197_v9, %s1496_s9  ;;  %s1292_s8 = sshll.u32 %s188_s7, 5 }
  0x1f   : > { %1315 = vmatmul.mubr.msk.f32.vlgmr.msra.gmra.mrb[0].mxu0 %vm248_vm0, %v1313_v12  ;;  %v222_v12 = vld [vmem:[%s1805_s1 + $0x8] sm:$0xff]  ;;  %s190_s10 = scalar_lea.vmem [#allocation2], %s1292_s8 }
  0x20   : > { %839 = vmatprep.mubr.f32.mxu0 %v1494_v2  ;;  %s1226_s11 = sshll.u32 %s190_s10, 4  ;;  %s1755_s11 = int_to_ptr.vmem [resolvable:$true] %s1226_s11 }
  0x22   : > { %746 = vrot.lane.b32.xlu1 %v197_v9, %s1497_s12  ;;  %744 = vrot.lane.b32.xlu0 %v196_v6, %s1497_s12  ;;  %s1343_s12 = sshll.u32 %s1552_s19, 9  ;;  %s1504_s19 = smov [#allocation2]  }
  0x23   : > { %s1434_s27 = sshll.u32 %s1504_s19, 4  ;;  %s1435_s27 = int_to_ptr.vmem [resolvable:$false] %s1434_s27 }
  0x24   : > { %s1436_s28 = scalar_lea.vmem %s1435_s27, 1024  ;;  %p1437_p0 = scmp.lt.s32.totalorder %s1755_s11, %s1435_s27 }
  0x26   : > { %417 = vrot.lane.b32.xlu1 %v197_v9, %s1498_s13  ;;  %415 = vrot.lane.b32.xlu0 %v196_v6, %s1498_s13 }
  0x2a   : > { %858 = vrot.lane.b32.xlu1 %v197_v9, %s1499_s14  ;;  %856 = vrot.lane.b32.xlu0 %v196_v6, %s1499_s14 }
  0x2e   : > { %529 = vrot.lane.b32.xlu1 %v197_v9, %s1500_s20  ;;  %527 = vrot.lane.b32.xlu0 %v196_v6, %s1500_s20  ;;  %s1760_s20 = scalar_lea.hbm %s1808_s4, %s1343_s12 }
  0x32   : > { %970 = vrot.lane.b32.xlu1 %v197_v9, %s1501_s22  ;;  %968 = vrot.lane.b32.xlu0 %v196_v6, %s1501_s22  ;;  %s1762_s22 = scalar_lea.sflag [#allocation3], %s188_s7 }
  0x36   : > { %1082 = vrot.lane.b32.xlu1 %v197_v9, %s1502_s23  ;;  %1080 = vrot.lane.b32.xlu0 %v196_v6, %s1502_s23  ;;  %v1327_v9 = vld [vmem:[%s1806_s2 + $0xe] sm:$0x3]  ;;  %s1430_s23 = scalar_lea.vmem %s1755_s11, 512 }
  0x37   : > { %p1431_p11 = scmp.ne.s32.totalorder %s1755_s11, %s1430_s23  ;;  %p1438_p1 = scmp.lt.s32.totalorder %s1436_s28, %s1430_s23 }
  0x39   : > { %p1432_p12 = pnand %p1431_p11, %p1569_p5  ;;  %p1439_p2 = por %p1438_p1, %p1437_p0 }
  0x3a   : > { %1196 = vperm.xlu0 %1428, %v1192_v13   ;;  %1201 = vperm.xlu1 %1429, %v1193_v14   ;;  %v1323_v13 = vld [vmem:[%s1805_s1 + $0x60] sm:$0xff] }
  0x3b   : > { %p1433_p13 = pneg %p1432_p12 }
  0x3d   : > { %p1440_p3 = pnand %p1439_p2, %p1433_p13 }
  0x8c   : > { %v199_v19 = vpop.permute.xlu1 %198  ;;  %v224_v20 = vpop.permute.xlu0 %223 }
  0x90   : > { %v201_v26 = vpop.permute.xlu1 %200  ;;  %v226_v27 = vpop.permute.xlu0 %225 }
  0x91   : > { %v205_v30 = vsel %vm204_vm1, %v199_v19, %v201_v26  ;;  %v206_v31 = vsel %vm204_vm1, %v201_v26, %v199_v19  ;;  %v229_v32 = vsel %vm227_vm2, %v226_v27, %v224_v20  ;;  %v228_v33 = vsel %vm227_vm2, %v224_v20, %v226_v27 }
  0x92   : > { %v219_v34 = vmul.f32 %v212_v22, %v206_v31  ;;  %v220_v35 = vmul.f32 %v216_v23, %v205_v30  ;;  %v244_v36 = vmul.f32 %v240_v24, %v228_v33  ;;  %v243_v37 = vmul.f32 %v236_v25, %v229_v32  ;;  %v1332_v23 = vld [vmem:[%s1806_s2 + $0x10] sm:$0x3]  ;;  %v1303_v24 = vld [vmem:[%s1805_s1 + $0x20] sm:$0xff]  ;;  %v1324_v25 = vld [vmem:[%s1805_s1 + $0x68] sm:$0xff] }
  0x93   : > { %v981_v19 = vrot.slane %v1327_v9, %v1588_v5  ;;  %v985_v22 = vrot.slane %v1327_v9, %v1586_v4  ;;  %v1093_v30 = vrot.slane %v1332_v23, %v1588_v5  ;;  %v1097_v33 = vrot.slane %v1332_v23, %v1586_v4  ;;  %v1328_v5 = vld [vmem:[%s1805_s1 + $0x70] sm:$0xff] }
  0x94   : > { %v747_v40 = vpop.permute.xlu1 %746  ;;  %255 = vmatprep.subr.mxu1 %v244_v36  ;;  %v745_v41 = vpop.permute.xlu0 %744 }
  0x95   : > { %v749_v42 = vsel %vm748_vm3, %v745_v41, %v747_v40  ;;  %v750_v43 = vsel %vm748_vm3, %v747_v40, %v745_v41  ;;  %256 = vmatpush1.msra.mxu1 %v243_v37  ;;  %v1329_v40 = vld [vmem:[%s1805_s1 + $0x78] sm:$0xff]  ;;  %v1333_v41 = vld [vmem:[%s1805_s1 + $0x80] sm:$0xff] }
  0x96   : > { %v764_v45 = vmul.f32 %v757_v28, %v749_v42  ;;  %v765_v46 = vmul.f32 %v761_v29, %v750_v43  ;;  %1298 = vmatmul.mubr.msk.f32.vlgmr.msra.gmra.mrb[0].mxu1 %vm248_vm0, %v1296_v39  ;;  %338 = vmatprep.subr.mxu1 %v220_v35  ;;  %v1308_v39 = vld [vmem:[%s1805_s1 + $0x30] sm:$0xff]  ;;  %v1314_v42 = vld [vmem:[%s1805_s1 + $0x48] sm:$0xff] }
  0x97   : > { %339 = vmatpush1.msra.mxu1 %v219_v34  ;;  %325 = vmatprep.mubr.f32.mxu1 %v1494_v2  ;;  %v1304_v34 = vld [vmem:[%s1805_s1 + $0x28] sm:$0xff] }
  0x98   : > { %v418_v51 = vpop.permute.xlu1 %417  ;;  %v416_v52 = vpop.permute.xlu0 %415  ;;  %775 = vmatprep.subr.mxu0 %v765_v46 }
  0x99   : > { %v420_v53 = vsel %vm419_vm4, %v416_v52, %v418_v51  ;;  %v421_v54 = vsel %vm419_vm4, %v418_v51, %v416_v52  ;;  %776 = vmatpush1.msra.mxu0 %v764_v45 }
  0x9a   : > { %v435_v56 = vmul.f32 %v428_v44, %v421_v54  ;;  %v436_v57 = vmul.f32 %v432_v47, %v420_v53  ;;  %1299 = vmatmul.mubr.msk.f32.gmra.mrb[2].mxu1 %vm248_vm0, %v1297_v49  ;;  %1320 = vmatmul.mubr.msk.f32.vlgmr.msra.gmra.mrb[0].mxu0 %vm248_vm0, %v1318_v50 }
  0x9b   : > { %402 = vmatprep.mubr.f32.mxu1 %v1494_v2  ;;  %845 = vmatprep.mubr.f32.mxu0 %v1494_v2 }
  0x9c   : > { %v859_v62 = vpop.permute.xlu1 %858  ;;  %446 = vmatprep.subr.mxu1 %v436_v57  ;;  %v857_v63 = vpop.permute.xlu0 %856 }
  0x9d   : > { %v861_v0 = vsel %vm860_vm5, %v857_v63, %v859_v62  ;;  %v862_v1 = vsel %vm860_vm5, %v859_v62, %v857_v63 }
  0x9e   : > { %v876_v6 = vmul.f32 %v869_v55, %v861_v0  ;;  %v877_v7 = vmul.f32 %v873_v58, %v862_v1  ;;  %1300 = vmatmul.mubr.msk.f32.vlgmr.msra.gmra.mrb[0].mxu1 %vm248_vm0, %v221_v60  ;;  %1321 = vmatmul.mubr.msk.f32.gmra.mrb[2].mxu0 %vm248_vm0, %v1319_v61 }
  0x9f   : > { %447 = vmatpush1.msra.mxu1 %v435_v56  ;;  %408 = vmatprep.mubr.f32.mxu1 %v1494_v2 }
  0xa0   : > { %v530_v14 = vpop.permute.xlu1 %529  ;;  %v528_v15 = vpop.permute.xlu0 %527  ;;  %887 = vmatprep.subr.mxu0 %v877_v7  ;;  %951 = vmatprep.mubr.f32.mxu0 %v1494_v2 }
  0xa1   : > { %v532_v17 = vsel %vm531_vm6, %v528_v15, %v530_v14  ;;  %v533_v18 = vsel %vm531_vm6, %v530_v14, %v528_v15  ;;  %888 = vmatpush1.msra.mxu0 %v876_v6 }
  0xa2   : > { %v547_v20 = vmul.f32 %v540_v3, %v533_v18  ;;  %v548_v21 = vmul.f32 %v544_v8, %v532_v17  ;;  %1301 = vmatmul.mubr.msk.f32.gmra.mrb[2].mxu1 %vm248_vm0, %v222_v12  ;;  %1325 = vmatmul.mubr.msk.f32.vlgmr.msra.gmra.mrb[0].mxu0 %vm248_vm0, %v1323_v13 }
  0xa3   : > { %510 = vmatprep.mubr.f32.mxu1 %v1494_v2  ;;  %957 = vmatprep.mubr.f32.mxu0 %v1494_v2 }
  0xa4   : > { %v971_v26 = vpop.permute.xlu1 %970  ;;  %558 = vmatprep.subr.mxu1 %v548_v21  ;;  %v969_v27 = vpop.permute.xlu0 %968 }
  0xa5   : > { %v973_v28 = vsel %vm972_vm7, %v969_v27, %v971_v26  ;;  %v974_v29 = vsel %vm972_vm7, %v971_v26, %v969_v27 }
  0xa6   : > { %v988_v31 = vmul.f32 %v981_v19, %v973_v28  ;;  %v989_v32 = vmul.f32 %v985_v22, %v974_v29  ;;  %1305 = vmatmul.mubr.msk.f32.vlgmr.msra.gmra.mrb[0].mxu1 %vm248_vm0, %v1303_v24  ;;  %1326 = vmatmul.mubr.msk.f32.gmra.mrb[2].mxu0 %vm248_vm0, %v1324_v25 }
  0xa7   : > { %559 = vmatpush1.msra.mxu1 %v547_v20  ;;  %516 = vmatprep.mubr.f32.mxu1 %v1494_v2 }
  0xa8   : > { %999 = vmatprep.subr.mxu0 %v989_v32  ;;  %1063 = vmatprep.mubr.f32.mxu0 %v1494_v2  ;;  %v1083_v35 = vpop.permute.xlu1 %1082  ;;  %v1081_v36 = vpop.permute.xlu0 %1080 }
  0xa9   : > { %1000 = vmatpush1.msra.mxu0 %v988_v31  ;;  %v1085_v16 = vsel %vm1084_vm8, %v1081_v36, %v1083_v35  ;;  %v1086_v37 = vsel %vm1084_vm8, %v1083_v35, %v1081_v36  ;;  %1344 = vmatprep.subr.mxu1 %v1596_v10  ;;  %v1309_v10 = vld [vmem:[%s1805_s1 + $0x38] sm:$0xff] }
  0xaa   : > { %1306 = vmatmul.mubr.msk.f32.gmra.mrb[2].mxu1 %vm248_vm0, %v1304_v34  ;;  %1330 = vmatmul.mubr.msk.f32.vlgmr.msra.gmra.mrb[0].mxu0 %vm248_vm0, %v1328_v5  ;;  %v1100_v4 = vmul.f32 %v1093_v30, %v1085_v16  ;;  %v1101_v38 = vmul.f32 %v1097_v33, %v1086_v37 }
  0xab   : > { %622 = vmatprep.mubr.f32.mxu1 %v1494_v2  ;;  %1069 = vmatprep.mubr.f32.mxu0 %v1494_v2 }
  0xac   : > { %1111 = vmatprep.subr.mxu0 %v1101_v38 }
  0xad   : > { %1112 = vmatpush1.msra.mxu0 %v1100_v4 }
  0xae   : > { %1310 = vmatmul.mubr.msk.f32.vlgmr.msra.gmra.mrb[0].mxu1 %vm248_vm0, %v1308_v39  ;;  %1331 = vmatmul.mubr.msk.f32.gmra.mrb[2].mxu0 %vm248_vm0, %v1329_v40 }
  0xaf   : > { %628 = vmatprep.mubr.f32.mxu1 %v1494_v2  ;;  %1345 = vmatpush1.msra.mxu1 %v1598_v11  ;;  %v1334_v11 = vld [vmem:[%s1805_s1 + $0x88] sm:$0xff] }
  0xb0   : > { %1175 = vmatprep.mubr.f32.mxu0 %v1494_v2 }
  0xb2   : > { %1311 = vmatmul.mubr.msk.f32.gmra.mrb[2].mxu1 %vm248_vm0, %v1309_v10  ;;  %1335 = vmatmul.mubr.msk.f32.vlgmr.msra.gmra.mrb[0].mxu0 %vm248_vm0, %v1333_v41 }
  0xb3   : > { %1181 = vmatprep.mubr.f32.mxu0 %v1494_v2  ;;  %733 = vmatprep.mubr.f32.mxu1 %v1494_v2 }
  0xb6   : > { %1336 = vmatmul.mubr.msk.f32.gmra.mrb[2].mxu0 %vm248_vm0, %v1334_v11 }
  0xb9   : > { %v1197_v46 = vpop.permute.xlu0 %1196  ;;  %v1202_v54 = vpop.permute.xlu1 %1201 }
  0xba   : > { %1316 = vmatmul.mubr.msk.f32.vlgmr.msra.gmra.mrb[2].mxu1 %vm248_vm0, %v1314_v42 }
 0x181   : > { %v624_v43 = vpop.f32.mrb[0].mxu1 }
 0x182   : > { %v626_v44 = vpop.f32.mrb[1].mxu1 }
 0x185   : > { %v1177_v45 = vpop.f32.mrb[0].mxu0 }
 0x186   : > { %v1346_v47 = vadd.f32 %v1177_v45, %v624_v43  ;;  %v1179_v48 = vpop.f32.mrb[1].mxu0 }
 0x187   : > { %v1347_v49 = vadd.f32 %v1179_v48, %v626_v44 }
 0x188   : > { %v1204_v50 = vadd.f32 %v1346_v47, %v1197_v46 }
 0x189   : > { %v1205_v2 = vadd.f32 %v1347_v49, %v1197_v46  ;;  %v1183_v51 = vpop.f32.mrb[2].mxu0 }
 0x18a   : > { %1208 = vst [vmem:[%s190_s10] sm:$0xff] %v1204_v50  ;;  %v1185_v52 = vpop.f32.mrb[3].mxu0 }
 0x18b   : > { %1209 = vst [vmem:[%s190_s10 + $0x8] sm:$0xff] %v1205_v2 }
 0x18d   : > { %v735_v53 = vpop.f32.mrb[2].mxu1 }
 0x18e   : > { %v1348_v55 = vadd.f32 %v1183_v51, %v735_v53  ;;  %v737_v56 = vpop.f32.mrb[3].mxu1 }
 0x18f   : > { %v1349_v57 = vadd.f32 %v1185_v52, %v737_v56 }
 0x190   : > { %v1206_v58 = vadd.f32 %v1348_v55, %v1202_v54 }
 0x191   : > { %v1207_v59 = vadd.f32 %v1349_v57, %v1202_v54 }
 0x192   : > { %1210 = vst [vmem:[%s190_s10 + $0x10] sm:$0xff] %v1206_v58 }
 0x193   : > { %1211 = vst [vmem:[%s190_s10 + $0x18] sm:$0xff] %v1207_v59 }
 0x194   : > { %1443 = shalt.err (!%p1440_p3)
}
 0x195   : > { %s1444_s29 = scalar_lea.hbm %s1760_s20, 512  ;;  %s1448_s6 = scalar_lea.hbm %s1808_s4, 1024 }
 0x196   : > { %p1445_p4 = scmp.ne.s32.totalorder %s1760_s20, %s1444_s29  ;;  %p1449_p9 = scmp.lt.u32.totalorder %s1760_s20, %s1808_s4 }
 0x197   : > { %p1450_p10 = scmp.lt.u32.totalorder %s1448_s6, %s1444_s29  ;;  %p1452_p12 = scmp.lt.u32.totalorder %s1444_s29, %s1760_s20 }
 0x198   : > { %p1446_p7 = pnand %p1445_p4, %p1569_p5 }
 0x199   : > { %p1451_p11 = por %p1450_p10, %p1449_p9 }
 0x19a   : > { %p1447_p8 = pneg %p1446_p7 }
 0x19b   : > { %p1453_p13 = por %p1452_p12, %p1451_p11 }
 0x19d   : > { %p1454_p0 = pnand %p1453_p13, %p1447_p8 }
 0x19f   : > { %1457 = shalt.err (!%p1454_p0)
}
 0x1a0   : > { %s1505_s10 = smov 256  }
 0x1a1   : > { %1378 = dma.vmem_to_hbm [thread:$0]  (%p1569_p5), %s1755_s11, 512, %s1760_s20, %s1762_s22, %s1505_s10, %s1505_s10, %s1496_s9  }
 0x1a2 PF: > { %p1384_p1 = scmp.ge.s32.totalorder %s1492_s18, 2  ;;  %s1241_s12 = sand.u32 1, %s1480_s15  }
 0x1a3   : > { %s1242_s13 = scalar_lea.sflag [#allocation3], %s1241_s12 }
 0x1a4   : > { %p1381_p2 = pnand %p1384_p1, %p1573_p6 }
 0x1a6   : > { %1475 = dma.done.wait (!%p1381_p2), %s1242_s13, 512  }
 0x1a7   : > { %1477 = vsyncadd (!%p1381_p2), %s1242_s13, 4294966784  ;;  %p14_p3 = scmp.ge.s32.totalorder %s1556_s21, 4   ;;  %s1811_s15 = smov %s1484_s16 }
 0x1a8   : > { %s1812_s16 = smov %s1488_s17  ;;  %s1813_s17 = smov %s1567_s24 }
 0x1a9   : > { %s1814_s18 = smov %s1556_s21  ;;  %16 = sbr.rel (!%p14_p3) target bundleno = 3 (0x3), region = 87 }
 0x1b0   :  { %1247 = vsyncpa [#allocation3], 1 }
 0x1b1   :  { %1249 = vsyncpa [#allocation3 + $0x1], 1 }

</bundles_post_ra>
